<compile_context>
chip_gen: v7x
topology: tpu7x:2x2x1
jax: 0.10.0
libtpu: 0.0.40
codegen_flags: <defaults>
</compile_context>

<pallas_src>
import functools
import math

import jax
import jax.numpy as jnp
from jax import lax
from jax.experimental import pallas as pl
from jax.experimental.pallas import tpu as pltpu


# ----------------------------- Pallas kernel --------------------------------


def _bottleneck_kernel(x_ref, w1_ref, s1_ref, b1_ref,
                       w2_ref, s2_ref, b2_ref,
                       w3_ref, s3_ref, b3_ref,
                       o_ref, *, h):
    """Fused conv1x1+bn+relu -> conv3x3+bn+relu -> conv1x1+bn+residual+relu.

    Per grid step (Nb images, rows = Nb*h):
      x_ref  : (M, W*Cin)        f32   (also the residual)
      w1_ref : (W*Cin,  W*Cmid)  bf16  block-diagonal 1x1 conv
      w2_ref : (3*W*Cmid, W*Cmid) bf16 banded 3x3 conv, vertical taps stacked on K
      w3_ref : (W*Cmid, W*Cexp)  bf16  block-diagonal 1x1 conv
      s*/b*  : (1, W*C*)         f32   folded BN scale / bias (tiled over W)
      o_ref  : (M, W*Cexp)       f32
    """
    m = x_ref.shape[0]

    # ---- stage 1: conv1x1 (block-diagonal matmul) + bn1 + relu ----
    x_bf = x_ref[...].astype(jnp.bfloat16)
    y1 = jnp.dot(x_bf, w1_ref[...], preferred_element_type=jnp.float32)
    y1 = jnp.maximum(y1 * s1_ref[...] + b1_ref[...], 0.0)      # (m, WCmid) f32

    # ---- stage 2: conv3x3 = one fused matmul over the 3 vertical taps ----
    # Rows are n*h + row-within-image; dy=+/-1 operands come from sublane rolls
    # (XLU), with image-boundary rows masked to zero (no cross-image leakage,
    # implements the vertical zero padding).
    hrow = lax.broadcasted_iota(jnp.int32, y1.shape, 0) % h
    up = jnp.where(hrow != 0, pltpu.roll(y1, shift=1, axis=0), 0.0)       # row h-1
    dn = jnp.where(hrow != h - 1, pltpu.roll(y1, shift=m - 1, axis=0), 0.0)  # row h+1
    q = jnp.concatenate([up, y1, dn], axis=-1).astype(jnp.bfloat16)       # (m, 3*WCmid)
    t = jnp.dot(q, w2_ref[...], preferred_element_type=jnp.float32)
    t = jnp.maximum(t * s2_ref[...] + b2_ref[...], 0.0)

    # ---- stage 3: conv1x1 + bn3 + residual + relu ----
    u = jnp.dot(t.astype(jnp.bfloat16), w3_ref[...],
                preferred_element_type=jnp.float32)
    u = u * s3_ref[...] + b3_ref[...] + x_ref[...]              # f32 residual
    o_ref[...] = jnp.maximum(u, 0.0).astype(o_ref.dtype)


# ------------------------------ host wrapper ---------------------------------


def _fold_bn(gamma, beta, mean, var, eps=1e-5):
    s = gamma / jnp.sqrt(var + eps)
    return s, beta - mean * s


def _pick_batch_block(n, h, max_rows=256):
    """Largest divisor Nb of n with Nb*h <= max_rows, keeping >=2 grid steps
    (so both v7x TensorCores get work when n >= 2)."""
    best = 1
    for nb in range(1, n + 1):
        if n % nb or nb * h > max_rows:
            continue
        if n >= 2 and n // nb < 2:
            continue
        best = nb
    return best


def bottleneck_forward(x_nchw, params):
    """Pallas implementation of Bottleneck.forward (eval-mode BN, stride=1)."""
    (w1, w2, cb2, w3,
     g1, b1, m1, v1,
     g2, b2, m2, v2,
     g3, b3, m3, v3) = params

    N, Cin, H, W = x_nchw.shape
    Cmid = w1.shape[0]            # outplanes
    Cexp = w3.shape[0]            # outplanes * expansion
    assert Cexp == Cin, "identity add requires inplanes == outplanes * expansion"

    # Pad Cmid so W*Cmid is a multiple of 128 (lane-dense intermediates).
    gstep = 128 // math.gcd(W, 128)
    Cmid_p = ((Cmid + gstep - 1) // gstep) * gstep
    WCin, WCmid, WCexp = W * Cin, W * Cmid_p, W * Cexp

    # NCHW -> NHWC -> (N*H, W*Cin) slab (free contiguous views after transpose).
    x2d = jnp.transpose(x_nchw, (0, 2, 3, 1)).reshape(N * H, WCin).astype(jnp.float32)

    # ---- fold batch norms (and conv2's bias) into per-channel scale / bias ----
    s1, bb1 = _fold_bn(g1, b1, m1, v1)
    s2, bb2 = _fold_bn(g2, b2, m2, v2)
    bb2 = bb2 + cb2 * s2                       # conv2 has bias=True
    s3, bb3 = _fold_bn(g3, b3, m3, v3)

    def pad_mid(v):   # zero pad -> padded channels stay 0 through relu
        return jnp.zeros((Cmid_p,), jnp.float32).at[:Cmid].set(v)

    def tile_w(v, wc):
        return jnp.tile(v, W).reshape(1, wc).astype(jnp.float32)

    s1t, b1t = tile_w(pad_mid(s1), WCmid), tile_w(pad_mid(bb1), WCmid)
    s2t, b2t = tile_w(pad_mid(s2), WCmid), tile_w(pad_mid(bb2), WCmid)
    s3t, b3t = tile_w(s3, WCexp), tile_w(bb3, WCexp)

    # ---- build lane-expanded weight matrices (W folded into matmul dims) ----
    w1c = jnp.zeros((Cmid_p, Cin), jnp.float32).at[:Cmid, :].set(w1[:, :, 0, 0])
    w3c = jnp.zeros((Cexp, Cmid_p), jnp.float32).at[:, :Cmid].set(w3[:, :, 0, 0])
    w2c = jnp.zeros((Cmid_p, Cmid_p, 3, 3), jnp.float32).at[:Cmid, :Cmid].set(w2)

    # 1x1 convs -> block-diagonal (W*Cin, W*Cout): [(w,ci),(w',co)] = d(w,w')*w[co,ci]
    eye_w = jnp.eye(W, dtype=jnp.float32)
    w1_bd = jnp.einsum('ab,oi->aibo', eye_w, w1c).reshape(WCin, WCmid)
    w3_bd = jnp.einsum('ab,oi->aibo', eye_w, w3c).reshape(WCmid, WCexp)
    # 3x3 conv -> banded matrices per vertical tap dy (horizontal taps + padding
    # encoded by shifted identities over W), stacked along K for ONE fused matmul.
    shifts = jnp.stack([jnp.eye(W, k=1 - kx, dtype=jnp.float32) for kx in range(3)])
    w2_stack = jnp.einsum('xab,oiyx->yaibo', shifts, w2c).reshape(3 * WCmid, WCmid)

    # bf16 weights: half the bytes, bf16-native MXU on all generations.
    w1_bd = w1_bd.astype(jnp.bfloat16)
    w2_stack = w2_stack.astype(jnp.bfloat16)
    w3_bd = w3_bd.astype(jnp.bfloat16)

    Nb = _pick_batch_block(N, H)          # images per grid step
    M = Nb * H                            # matmul rows per step
    grid = (N // Nb,)

    out2d = pl.pallas_call(
        functools.partial(_bottleneck_kernel, h=H),
        out_shape=jax.ShapeDtypeStruct((N * H, WCexp), jnp.float32),
        grid=grid,
        in_specs=[
            pl.BlockSpec((M, WCin), lambda n: (n, 0)),             # x (+ residual)
            pl.BlockSpec((WCin, WCmid), lambda n: (0, 0)),         # w1 block-diag
            pl.BlockSpec((1, WCmid), lambda n: (0, 0)),            # bn1 scale
            pl.BlockSpec((1, WCmid), lambda n: (0, 0)),            # bn1 bias
            pl.BlockSpec((3 * WCmid, WCmid), lambda n: (0, 0)),    # w2 banded, taps stacked
            pl.BlockSpec((1, WCmid), lambda n: (0, 0)),            # bn2 scale
            pl.BlockSpec((1, WCmid), lambda n: (0, 0)),            # bn2 bias (+conv2 bias)
            pl.BlockSpec((WCmid, WCexp), lambda n: (0, 0)),        # w3 block-diag
            pl.BlockSpec((1, WCexp), lambda n: (0, 0)),            # bn3 scale
            pl.BlockSpec((1, WCexp), lambda n: (0, 0)),            # bn3 bias
        ],
        out_specs=pl.BlockSpec((M, WCexp), lambda n: (n, 0)),
        compiler_params=pltpu.CompilerParams(
            dimension_semantics=("parallel",),
        ),
    )(x2d, w1_bd, s1t, b1t, w2_stack, s2t, b2t, w3_bd, s3t, b3t)

    # (N*H, W*Cexp) -> NHWC -> NCHW (module interface).
    return jnp.transpose(out2d.reshape(N, H, W, Cexp), (0, 3, 1, 2))


# ------------------------------ pure-JAX reference ---------------------------


def bottleneck_reference(x, params, eps=1e-5):
    (w1, w2, cb2, w3,
     g1, b1, m1, v1,
     g2, b2, m2, v2,
     g3, b3, m3, v3) = params

    def conv(x, w, padding=0):
        return lax.conv_general_dilated(
            x, w, (1, 1), [(padding, padding)] * 2,
            dimension_numbers=("NCHW", "OIHW", "NCHW"))

    def bn(x, g, b, m, v):
        s = g / jnp.sqrt(v + eps)
        return x * s[None, :, None, None] + (b - m * s)[None, :, None, None]

    out = jax.nn.relu(bn(conv(x, w1), g1, b1, m1, v1))
    out = jax.nn.relu(bn(conv(out, w2, padding=1) + cb2[None, :, None, None],
                         g2, b2, m2, v2))
    out = bn(conv(out, w3), g3, b3, m3, v3)
    return jax.nn.relu(out + x)


# ------------------------------------ main -----------------------------------


if __name__ == "__main__":
    # Bottleneck(inplanes=16, outplanes=4, stride=1, downsample=None)
    N, H, W = 8, 16, 16
    inplanes, outplanes = 16, 4
    Cexp = outplanes * 4          # == inplanes, so the identity residual is valid

    key = jax.random.PRNGKey(0)
    ks = jax.random.split(key, 8)

    x = jax.random.normal(ks[0], (N, inplanes, H, W), jnp.float32)

    w1 = 0.2 * jax.random.normal(ks[1], (outplanes, inplanes, 1, 1), jnp.float32)
    w2 = 0.2 * jax.random.normal(ks[2], (outplanes, outplanes, 3, 3), jnp.float32)
    cb2 = 0.1 * jax.random.normal(ks[3], (outplanes,), jnp.float32)
    w3 = 0.2 * jax.random.normal(ks[4], (Cexp, outplanes, 1, 1), jnp.float32)

    def bn_params(k, c):
        a, b, c_, d = jax.random.split(k, 4)
        gamma = 0.5 + jax.random.uniform(a, (c,), jnp.float32)
        beta = 0.1 * jax.random.normal(b, (c,), jnp.float32)
        mean = 0.1 * jax.random.normal(c_, (c,), jnp.float32)
        var = 0.5 + jax.random.uniform(d, (c,), jnp.float32)
        return gamma, beta, mean, var

    g1, b1, m1, v1 = bn_params(ks[5], outplanes)
    g2, b2, m2, v2 = bn_params(ks[6], outplanes)
    g3, b3, m3, v3 = bn_params(ks[7], Cexp)

    params = (w1, w2, cb2, w3,
              g1, b1, m1, v1,
              g2, b2, m2, v2,
              g3, b3, m3, v3)

    fwd = jax.jit(bottleneck_forward)
    out = jax.block_until_ready(fwd(x, params))

    ref = jax.block_until_ready(bottleneck_reference(x, params))
    assert out.shape == (N, Cexp, H, W)
    max_err = float(jnp.max(jnp.abs(out - ref)))
    # Tolerance accounts for bf16 matmul inputs (f32 accumulation / epilogue).
    assert jnp.allclose(out, ref, rtol=2e-2, atol=2e-2), f"max abs err {max_err}"

    print("KERNEL_OK")
</pallas_src>

<mosaic_0001>
module attributes {stable_mosaic.version = 11 : i64} {
  func.func @_bottleneck_kernel(%arg0: i32, %arg1: memref<64x256xf32, #tpu.memory_space<vmem>>, %arg2: memref<256x128xbf16, #tpu.memory_space<vmem>>, %arg3: memref<1x128xf32, #tpu.memory_space<vmem>>, %arg4: memref<1x128xf32, #tpu.memory_space<vmem>>, %arg5: memref<384x128xbf16, #tpu.memory_space<vmem>>, %arg6: memref<1x128xf32, #tpu.memory_space<vmem>>, %arg7: memref<1x128xf32, #tpu.memory_space<vmem>>, %arg8: memref<128x256xbf16, #tpu.memory_space<vmem>>, %arg9: memref<1x256xf32, #tpu.memory_space<vmem>>, %arg10: memref<1x256xf32, #tpu.memory_space<vmem>>, %arg11: memref<64x256xf32, #tpu.memory_space<vmem>>) attributes {dimension_semantics = [#tpu.dimension_semantics<parallel>], iteration_bounds = array<i64: 2>, scalar_prefetch = 0 : i64, scratch_operands = 0 : i64, tpu.core_type = #tpu.core_type<tc>, window_params = [{transform_indices = @transform_0, window_bounds = array<i64: 64, 256>}, {pipeline_mode = #tpu.pipeline_mode<synchronous>, transform_indices = @transform_1, window_bounds = array<i64: 256, 128>}, {pipeline_mode = #tpu.pipeline_mode<synchronous>, transform_indices = @transform_2, window_bounds = array<i64: 1, 128>}, {pipeline_mode = #tpu.pipeline_mode<synchronous>, transform_indices = @transform_3, window_bounds = array<i64: 1, 128>}, {pipeline_mode = #tpu.pipeline_mode<synchronous>, transform_indices = @transform_4, window_bounds = array<i64: 384, 128>}, {pipeline_mode = #tpu.pipeline_mode<synchronous>, transform_indices = @transform_5, window_bounds = array<i64: 1, 128>}, {pipeline_mode = #tpu.pipeline_mode<synchronous>, transform_indices = @transform_6, window_bounds = array<i64: 1, 128>}, {pipeline_mode = #tpu.pipeline_mode<synchronous>, transform_indices = @transform_7, window_bounds = array<i64: 128, 256>}, {pipeline_mode = #tpu.pipeline_mode<synchronous>, transform_indices = @transform_8, window_bounds = array<i64: 1, 256>}, {pipeline_mode = #tpu.pipeline_mode<synchronous>, transform_indices = @transform_9, window_bounds = array<i64: 1, 256>}, {transform_indices = @transform_10, window_bounds = array<i64: 64, 256>}]} {
    %c0 = arith.constant 0 : index
    %c0_0 = arith.constant 0 : index
    %0 = vector.load %arg1[%c0, %c0_0] : memref<64x256xf32, #tpu.memory_space<vmem>>, vector<64x256xf32>
    %1 = arith.truncf %0 : vector<64x256xf32> to vector<64x256xbf16>
    %c0_1 = arith.constant 0 : index
    %c0_2 = arith.constant 0 : index
    %2 = vector.load %arg2[%c0_1, %c0_2] : memref<256x128xbf16, #tpu.memory_space<vmem>>, vector<256x128xbf16>
    %cst = arith.constant dense<0.000000e+00> : vector<64x128xf32>
    %3 = tpu.matmul %1, %2, %cst {dimension_numbers = #tpu.dot_dimension_numbers<[1], [0], [0], [1], [0, 0, 1, 1], [], []>} : vector<64x256xbf16>, vector<256x128xbf16>, vector<64x128xf32> -> vector<64x128xf32>
    %c0_3 = arith.constant 0 : index
    %c0_4 = arith.constant 0 : index
    %4 = vector.load %arg3[%c0_3, %c0_4] : memref<1x128xf32, #tpu.memory_space<vmem>>, vector<1x128xf32>
    %5 = vector.broadcast %4 : vector<1x128xf32> to vector<64x128xf32>
    %6 = arith.mulf %3, %5 : vector<64x128xf32>
    %c0_5 = arith.constant 0 : index
    %c0_6 = arith.constant 0 : index
    %7 = vector.load %arg4[%c0_5, %c0_6] : memref<1x128xf32, #tpu.memory_space<vmem>>, vector<1x128xf32>
    %8 = vector.broadcast %7 : vector<1x128xf32> to vector<64x128xf32>
    %9 = arith.addf %6, %8 : vector<64x128xf32>
    %cst_7 = arith.constant 0.000000e+00 : f32
    %10 = vector.broadcast %cst_7 : f32 to vector<64x128xf32>
    %11 = arith.maximumf %9, %10 : vector<64x128xf32>
    %12 = tpu.iota {dimensions = array<i32: 0>} : vector<64x128xi32>
    %c16_i32 = arith.constant 16 : i32
    %c0_i32 = arith.constant 0 : i32
    %13 = arith.cmpi eq, %c16_i32, %c0_i32 : i32
    %c1_i32 = arith.constant 1 : i32
    %14 = arith.select %13, %c1_i32, %c16_i32 : i32
    %15 = vector.broadcast %14 : i32 to vector<64x128xi32>
    %16 = arith.remsi %12, %15 : vector<64x128xi32>
    %c0_i32_8 = arith.constant 0 : i32
    %17 = vector.broadcast %c0_i32_8 : i32 to vector<64x128xi32>
    %18 = arith.cmpi ne, %16, %17 : vector<64x128xi32>
    %c0_i32_9 = arith.constant 0 : i32
    %19 = vector.broadcast %c0_i32_9 : i32 to vector<64x128xi32>
    %20 = arith.cmpi slt, %16, %19 : vector<64x128xi32>
    %c0_i32_10 = arith.constant 0 : i32
    %21 = arith.cmpi slt, %14, %c0_i32_10 : i32
    %22 = vector.broadcast %21 : i1 to vector<64x128xi1>
    %23 = vector.broadcast %22 : vector<64x128xi1> to vector<64x128xi1>
    %24 = arith.xori %20, %23 : vector<64x128xi1>
    %25 = arith.andi %24, %18 : vector<64x128xi1>
    %26 = vector.broadcast %14 : i32 to vector<64x128xi32>
    %27 = arith.addi %16, %26 : vector<64x128xi32>
    %28 = arith.select %25, %27, %16 : vector<64x128xi1>, vector<64x128xi32>
    %c0_i32_11 = arith.constant 0 : i32
    %29 = vector.broadcast %c0_i32_11 : i32 to vector<64x128xi32>
    %30 = arith.cmpi ne, %28, %29 : vector<64x128xi32>
    %c1_i32_12 = arith.constant 1 : i32
    %31 = tpu.dynamic_rotate %11 by %c1_i32_12 dim 0 : vector<64x128xf32>, i32 -> vector<64x128xf32>
    %cst_13 = arith.constant 0.000000e+00 : f32
    %32 = vector.broadcast %cst_13 : f32 to vector<64x128xf32>
    %33 = arith.select %30, %31, %32 : vector<64x128xi1>, vector<64x128xf32>
    %c15_i32 = arith.constant 15 : i32
    %34 = vector.broadcast %c15_i32 : i32 to vector<64x128xi32>
    %35 = arith.cmpi ne, %28, %34 : vector<64x128xi32>
    %c63_i32 = arith.constant 63 : i32
    %36 = tpu.dynamic_rotate %11 by %c63_i32 dim 0 : vector<64x128xf32>, i32 -> vector<64x128xf32>
    %cst_14 = arith.constant 0.000000e+00 : f32
    %37 = vector.broadcast %cst_14 : f32 to vector<64x128xf32>
    %38 = arith.select %35, %36, %37 : vector<64x128xi1>, vector<64x128xf32>
    %39 = tpu.concatenate %33, %11, %38 in 1 : vector<64x128xf32>, vector<64x128xf32>, vector<64x128xf32> -> vector<64x384xf32>
    %40 = arith.truncf %39 : vector<64x384xf32> to vector<64x384xbf16>
    %c0_15 = arith.constant 0 : index
    %c0_16 = arith.constant 0 : index
    %41 = vector.load %arg5[%c0_15, %c0_16] : memref<384x128xbf16, #tpu.memory_space<vmem>>, vector<384x128xbf16>
    %cst_17 = arith.constant dense<0.000000e+00> : vector<64x128xf32>
    %42 = tpu.matmul %40, %41, %cst_17 {dimension_numbers = #tpu.dot_dimension_numbers<[1], [0], [0], [1], [0, 0, 1, 1], [], []>} : vector<64x384xbf16>, vector<384x128xbf16>, vector<64x128xf32> -> vector<64x128xf32>
    %c0_18 = arith.constant 0 : index
    %c0_19 = arith.constant 0 : index
    %43 = vector.load %arg6[%c0_18, %c0_19] : memref<1x128xf32, #tpu.memory_space<vmem>>, vector<1x128xf32>
    %44 = vector.broadcast %43 : vector<1x128xf32> to vector<64x128xf32>
    %45 = arith.mulf %42, %44 : vector<64x128xf32>
    %c0_20 = arith.constant 0 : index
    %c0_21 = arith.constant 0 : index
    %46 = vector.load %arg7[%c0_20, %c0_21] : memref<1x128xf32, #tpu.memory_space<vmem>>, vector<1x128xf32>
    %47 = vector.broadcast %46 : vector<1x128xf32> to vector<64x128xf32>
    %48 = arith.addf %45, %47 : vector<64x128xf32>
    %cst_22 = arith.constant 0.000000e+00 : f32
    %49 = vector.broadcast %cst_22 : f32 to vector<64x128xf32>
    %50 = arith.maximumf %48, %49 : vector<64x128xf32>
    %51 = arith.truncf %50 : vector<64x128xf32> to vector<64x128xbf16>
    %c0_23 = arith.constant 0 : index
    %c0_24 = arith.constant 0 : index
    %52 = vector.load %arg8[%c0_23, %c0_24] : memref<128x256xbf16, #tpu.memory_space<vmem>>, vector<128x256xbf16>
    %cst_25 = arith.constant dense<0.000000e+00> : vector<64x256xf32>
    %53 = tpu.matmul %51, %52, %cst_25 {dimension_numbers = #tpu.dot_dimension_numbers<[1], [0], [0], [1], [0, 0, 1, 1], [], []>} : vector<64x128xbf16>, vector<128x256xbf16>, vector<64x256xf32> -> vector<64x256xf32>
    %c0_26 = arith.constant 0 : index
    %c0_27 = arith.constant 0 : index
    %54 = vector.load %arg9[%c0_26, %c0_27] : memref<1x256xf32, #tpu.memory_space<vmem>>, vector<1x256xf32>
    %55 = vector.broadcast %54 : vector<1x256xf32> to vector<64x256xf32>
    %56 = arith.mulf %53, %55 : vector<64x256xf32>
    %c0_28 = arith.constant 0 : index
    %c0_29 = arith.constant 0 : index
    %57 = vector.load %arg10[%c0_28, %c0_29] : memref<1x256xf32, #tpu.memory_space<vmem>>, vector<1x256xf32>
    %58 = vector.broadcast %57 : vector<1x256xf32> to vector<64x256xf32>
    %59 = arith.addf %56, %58 : vector<64x256xf32>
    %c0_30 = arith.constant 0 : index
    %c0_31 = arith.constant 0 : index
    %60 = vector.load %arg1[%c0_30, %c0_31] : memref<64x256xf32, #tpu.memory_space<vmem>>, vector<64x256xf32>
    %61 = arith.addf %59, %60 : vector<64x256xf32>
    %cst_32 = arith.constant 0.000000e+00 : f32
    %62 = vector.broadcast %cst_32 : f32 to vector<64x256xf32>
    %63 = arith.maximumf %61, %62 : vector<64x256xf32>
    %c0_33 = arith.constant 0 : index
    %c0_34 = arith.constant 0 : index
    %64 = vector.load %arg11[%c0_33, %c0_34] : memref<64x256xf32, #tpu.memory_space<vmem>>, vector<64x256xf32>
    tpu.vector_store %arg11[%c0_33, %c0_34], %63 {strides = array<i32>} : memref<64x256xf32, #tpu.memory_space<vmem>>, vector<64x256xf32>,
    return
  }
  func.func @transform_0(%arg0: i32) -> (i32, i32) {
    %c0_i32 = arith.constant 0 : i32
    %c0_i32_0 = arith.constant 0 : i32
    return %arg0, %c0_i32 : i32, i32
  }
  func.func @transform_1(%arg0: i32) -> (i32, i32) {
    %c0_i32 = arith.constant 0 : i32
    %c0_i32_0 = arith.constant 0 : i32
    %c0_i32_1 = arith.constant 0 : i32
    return %c0_i32, %c0_i32_0 : i32, i32
  }
  func.func @transform_2(%arg0: i32) -> (i32, i32) {
    %c0_i32 = arith.constant 0 : i32
    %c0_i32_0 = arith.constant 0 : i32
    %c0_i32_1 = arith.constant 0 : i32
    return %c0_i32, %c0_i32_0 : i32, i32
  }
  func.func @transform_3(%arg0: i32) -> (i32, i32) {
    %c0_i32 = arith.constant 0 : i32
    %c0_i32_0 = arith.constant 0 : i32
    %c0_i32_1 = arith.constant 0 : i32
    return %c0_i32, %c0_i32_0 : i32, i32
  }
  func.func @transform_4(%arg0: i32) -> (i32, i32) {
    %c0_i32 = arith.constant 0 : i32
    %c0_i32_0 = arith.constant 0 : i32
    %c0_i32_1 = arith.constant 0 : i32
    return %c0_i32, %c0_i32_0 : i32, i32
  }
  func.func @transform_5(%arg0: i32) -> (i32, i32) {
    %c0_i32 = arith.constant 0 : i32
    %c0_i32_0 = arith.constant 0 : i32
    %c0_i32_1 = arith.constant 0 : i32
    return %c0_i32, %c0_i32_0 : i32, i32
  }
  func.func @transform_6(%arg0: i32) -> (i32, i32) {
    %c0_i32 = arith.constant 0 : i32
    %c0_i32_0 = arith.constant 0 : i32
    %c0_i32_1 = arith.constant 0 : i32
    return %c0_i32, %c0_i32_0 : i32, i32
  }
  func.func @transform_7(%arg0: i32) -> (i32, i32) {
    %c0_i32 = arith.constant 0 : i32
    %c0_i32_0 = arith.constant 0 : i32
    %c0_i32_1 = arith.constant 0 : i32
    return %c0_i32, %c0_i32_0 : i32, i32
  }
  func.func @transform_8(%arg0: i32) -> (i32, i32) {
    %c0_i32 = arith.constant 0 : i32
    %c0_i32_0 = arith.constant 0 : i32
    %c0_i32_1 = arith.constant 0 : i32
    return %c0_i32, %c0_i32_0 : i32, i32
  }
  func.func @transform_9(%arg0: i32) -> (i32, i32) {
    %c0_i32 = arith.constant 0 : i32
    %c0_i32_0 = arith.constant 0 : i32
    %c0_i32_1 = arith.constant 0 : i32
    return %c0_i32, %c0_i32_0 : i32, i32
  }
  func.func @transform_10(%arg0: i32) -> (i32, i32) {
    %c0_i32 = arith.constant 0 : i32
    %c0_i32_0 = arith.constant 0 : i32
    return %arg0, %c0_i32 : i32, i32
  }
}

</mosaic_0001>

<bundles_post_ra>
// kernel: tile.33
= control target key start
LH: loop header
LB: loop body
LE: loop exit
PB: predicated region body
PF: predicated region fallthrough
CT: control target
= control target key end

     0   :  { %s28_s0 = inlined_call_operand.vmem [shape: f32[8], index: 0, kind: input, shape index: {}]   ;;  %s29_s1 = inlined_call_operand.vmem [shape: f32[16,8], index: 1, kind: output, shape index: {}]  }
   0x1   :  { %v4_v0 = vld [vmem:[%s28_s0] ss:$0 sm:$0xff] }
   0x2   :  { %5 = vst [vmem:[%s29_s1] sm:$0xff] %v4_v0  ;;  %8 = vst [vmem:[%s29_s1 + $0x8] sm:$0xff] %v4_v0 }

// kernel: tile.34
= control target key start
LH: loop header
LB: loop body
LE: loop exit
PB: predicated region body
PF: predicated region fallthrough
CT: control target
= control target key end

     0   :  { %s131_s10 = smov 120   ;;  %s132_s11 = smov 104   ;;  %vm3_vm0 = vcmask 64512   ;;  %vm9_vm1 = vcmask 1048512   ;;  %vm15_vm2 = vcmask 982912   ;;  %vm21_vm3 = vcmask 917312   ;;  %s207_s0 = inlined_call_operand.vmem [shape: f32[16,8], index: 0, kind: input, shape index: {}]   ;;  %s208_s1 = inlined_call_operand.vmem [shape: f32[1,128], index: 1, kind: output, shape index: {}]  }
   0x1   :  { %v101_v0 = vld [vmem:[%s207_s0 + $0xf] sm:$0x1]   ;;  %v103_v1 = vld [vmem:[%s207_s0 + $0xd] sm:$0x1]   ;;  %v102_v2 = vld [vmem:[%s207_s0 + $0xe] sm:$0x1]  }
   0x2   :  { %7 = vrot.lane.b32.xlu0 %v101_v0, %s131_s10  ;;  %19 = vrot.lane.b32.xlu1 %v103_v1, %s132_s11  ;;  %v104_v3 = vld [vmem:[%s207_s0 + $0xc] sm:$0x1]   ;;  %s133_s16 = smov 112   ;;  %s134_s17 = smov 96   ;;  %v105_v4 = vld [vmem:[%s207_s0 + $0xb] sm:$0x1]  }
   0x3   :  { %v106_v5 = vld [vmem:[%s207_s0 + $0xa] sm:$0x1]   ;;  %v2_v6 = vld [vmem:[%s207_s0] sm:$0x1]   ;;  %s135_s24 = smov 88   ;;  %s136_s25 = smov 80  }
   0x4   :  { %4 = vst.msk [vmem:[#allocation0] sm:$0x1] %vm3_vm0, %v2_v6   ;;  %v107_v7 = vld [vmem:[%s207_s0 + $0x9] sm:$0x1]   ;;  %v108_v8 = vld [vmem:[%s207_s0 + $0x8] sm:$0x1]  }
   0x5   :  { %s137_s30 = smov 72   ;;  %s138_s2 = smov 64   ;;  %v109_v9 = vld [vmem:[%s207_s0 + $0x7] sm:$0x1]   ;;  %v110_v10 = vld [vmem:[%s207_s0 + $0x6] sm:$0x1]  }
   0x6   :  { %13 = vrot.lane.b32.xlu0 %v102_v2, %s133_s16  ;;  %25 = vrot.lane.b32.xlu1 %v104_v3, %s134_s17  ;;  %s139_s7 = smov 56   ;;  %s140_s8 = smov 48   ;;  %v111_v11 = vld [vmem:[%s207_s0 + $0x5] sm:$0x1]   ;;  %v112_v12 = vld [vmem:[%s207_s0 + $0x4] sm:$0x1]  }
   0x7   :  { %s141_s13 = smov 40   ;;  %s142_s14 = smov 32   ;;  %v113_v13 = vld [vmem:[%s207_s0 + $0x3] sm:$0x1]   ;;  %v114_v14 = vld [vmem:[%s207_s0 + $0x2] sm:$0x1]  }
   0x8   :  { %s143_s19 = smov 24   ;;  %s144_s20 = smov 16   ;;  %v115_v15 = vld [vmem:[%s207_s0 + $0x1] sm:$0x1]   ;;  %vm27_vm4 = vcmask 851712   ;;  %vm33_vm5 = vcmask 786112  }
   0x9   :  { %s145_s0 = smov 8   ;;  %vm39_vm6 = vcmask 720512   ;;  %vm45_vm7 = vcmask 654912   ;;  %vm51_vm8 = vcmask 589312   ;;  %vm57_vm9 = vcmask 523712  }
   0xa   :  { %31 = vrot.lane.b32.xlu0 %v105_v4, %s135_s24  ;;  %37 = vrot.lane.b32.xlu1 %v106_v5, %s136_s25  ;;  %vm63_vm10 = vcmask 458112   ;;  %vm69_vm11 = vcmask 392512   ;;  %vm75_vm12 = vcmask 326912   ;;  %vm81_vm13 = vcmask 261312  }
   0xb   :  { %vm87_vm14 = vcmask 195712   ;;  %vm93_vm15 = vcmask 130112  }
   0xe   :  { %43 = vrot.lane.b32.xlu0 %v107_v7, %s137_s30  ;;  %49 = vrot.lane.b32.xlu1 %v108_v8, %s138_s2 }
  0x12   :  { %55 = vrot.lane.b32.xlu0 %v109_v9, %s139_s7  ;;  %61 = vrot.lane.b32.xlu1 %v110_v10, %s140_s8 }
  0x16   :  { %67 = vrot.lane.b32.xlu0 %v111_v11, %s141_s13  ;;  %73 = vrot.lane.b32.xlu1 %v112_v12, %s142_s14 }
  0x1a   :  { %79 = vrot.lane.b32.xlu0 %v113_v13, %s143_s19  ;;  %85 = vrot.lane.b32.xlu1 %v114_v14, %s144_s20 }
  0x1e   :  { %91 = vrot.lane.b32.xlu0 %v115_v15, %s145_s0 }
  0x74   :  { %v8_v16 = vpop.permute.xlu0 %7   ;;  %v20_v17 = vpop.permute.xlu1 %19  }
  0x75   :  { %10 = vst.msk [vmem:[#allocation0] sm:$0x1] %vm9_vm1, %v8_v16  }
  0x78   :  { %v14_v18 = vpop.permute.xlu0 %13   ;;  %v26_v19 = vpop.permute.xlu1 %25  }
  0x79   :  { %16 = vst.msk [vmem:[#allocation0] sm:$0x1] %vm15_vm2, %v14_v18  }
  0x7a   :  { %22 = vst.msk [vmem:[#allocation0] sm:$0x1] %vm21_vm3, %v20_v17  }
  0x7b   :  { %28 = vst.msk [vmem:[#allocation0] sm:$0x1] %vm27_vm4, %v26_v19  }
  0x7c   :  { %v32_v20 = vpop.permute.xlu0 %31   ;;  %v38_v21 = vpop.permute.xlu1 %37  }
  0x7d   :  { %34 = vst.msk [vmem:[#allocation0] sm:$0x1] %vm33_vm5, %v32_v20  }
  0x7e   :  { %40 = vst.msk [vmem:[#allocation0] sm:$0x1] %vm39_vm6, %v38_v21  }
  0x80   :  { %v44_v22 = vpop.permute.xlu0 %43   ;;  %v50_v23 = vpop.permute.xlu1 %49  }
  0x81   :  { %46 = vst.msk [vmem:[#allocation0] sm:$0x1] %vm45_vm7, %v44_v22  }
  0x82   :  { %52 = vst.msk [vmem:[#allocation0] sm:$0x1] %vm51_vm8, %v50_v23  }
  0x84   :  { %v56_v24 = vpop.permute.xlu0 %55   ;;  %v62_v25 = vpop.permute.xlu1 %61  }
  0x85   :  { %58 = vst.msk [vmem:[#allocation0] sm:$0x1] %vm57_vm9, %v56_v24  }
  0x86   :  { %64 = vst.msk [vmem:[#allocation0] sm:$0x1] %vm63_vm10, %v62_v25  }
  0x88   :  { %v68_v26 = vpop.permute.xlu0 %67   ;;  %v74_v27 = vpop.permute.xlu1 %73  }
  0x89   :  { %70 = vst.msk [vmem:[#allocation0] sm:$0x1] %vm69_vm11, %v68_v26  }
  0x8a   :  { %76 = vst.msk [vmem:[#allocation0] sm:$0x1] %vm75_vm12, %v74_v27  }
  0x8c   :  { %v80_v28 = vpop.permute.xlu0 %79   ;;  %v86_v29 = vpop.permute.xlu1 %85  }
  0x8d   :  { %82 = vst.msk [vmem:[#allocation0] sm:$0x1] %vm81_vm13, %v80_v28  }
  0x8e   :  { %88 = vst.msk [vmem:[#allocation0] sm:$0x1] %vm87_vm14, %v86_v29  }
  0x90   :  { %v92_v30 = vpop.permute.xlu0 %91  }
  0x91   :  { %94 = vst.msk [vmem:[#allocation0] sm:$0x1] %vm93_vm15, %v92_v30  }
  0x98   :  { %v98_v31 = vld [vmem:[#allocation0] sm:$0x1] }
  0x99   :  { %100 = vst [vmem:[%s208_s1] sm:$0x1] %v98_v31 }

// kernel: tile.53
= control target key start
LH: loop header
LB: loop body
LE: loop exit
PB: predicated region body
PF: predicated region fallthrough
CT: control target
= control target key end

     0   :  { %s28_s0 = inlined_call_operand.vmem [shape: f32[16], index: 0, kind: input, shape index: {}]   ;;  %s29_s1 = inlined_call_operand.vmem [shape: f32[16,16], index: 1, kind: output, shape index: {}]  }
   0x1   :  { %v4_v0 = vld [vmem:[%s28_s0] ss:$0 sm:$0xff] }
   0x2   :  { %5 = vst [vmem:[%s29_s1] sm:$0xff] %v4_v0  ;;  %8 = vst [vmem:[%s29_s1 + $0x8] sm:$0xff] %v4_v0 }

// kernel: tile.54
= control target key start
LH: loop header
LB: loop body
LE: loop exit
PB: predicated region body
PF: predicated region fallthrough
CT: control target
= control target key end

     0   :  { %s7_s6 = smov 3  ;;  %s21_s9 = smov 3  ;;  %vm4_vm0 = vcmask 130048   ;;  %vm11_vm1 = vcmask 1048448   ;;  %vm18_vm2 = vcmask 917248   ;;  %vm25_vm3 = vcmask 786048   ;;  %s128_s0 = inlined_call_operand.vmem [shape: f32[16,16], index: 0, kind: input, shape index: {}]   ;;  %s129_s1 = inlined_call_operand.vmem [shape: f32[1,256], index: 1, kind: output, shape index: {}]  }
   0x1   :  { %v66_v0 = vld [vmem:[%s128_s0 + $0x7] ss:$8 sm:%s7_s6]   ;;  %s81_s10 = smov 112   ;;  %v68_v1 = vld [vmem:[%s128_s0 + $0x5] ss:$8 sm:%s21_s9]   ;;  %s14_s13 = smov 3 }
   0x2   :  { %9 = vrot.lane.b32.xlu0 %v66_v0, %s81_s10  ;;  %s82_s14 = smov 80   ;;  %v67_v2 = vld [vmem:[%s128_s0 + $0x6] ss:$8 sm:%s14_s13]   ;;  %s28_s17 = smov 3  ;;  %vm32_vm4 = vcmask 654848   ;;  %vm39_vm5 = vcmask 523648  }
   0x3   :  { %23 = vrot.lane.b32.xlu1 %v68_v1, %s82_s14  ;;  %v69_v3 = vld [vmem:[%s128_s0 + $0x4] ss:$8 sm:%s28_s17]   ;;  %s35_s20 = smov 3  ;;  %s42_s21 = smov 3  ;;  %vm46_vm6 = vcmask 392448   ;;  %vm53_vm7 = vcmask 261248  }
   0x4   :  { %s83_s22 = smov 96   ;;  %s84_s23 = smov 64   ;;  %v70_v4 = vld [vmem:[%s128_s0 + $0x3] ss:$8 sm:%s35_s20]   ;;  %v71_v5 = vld [vmem:[%s128_s0 + $0x2] ss:$8 sm:%s42_s21]  }
   0x5   :  { %s2_s26 = smov 3  ;;  %s49_s29 = smov 3 }
   0x6   :  { %16 = vrot.lane.b32.xlu0 %v67_v2, %s83_s22  ;;  %v3_v6 = vld [vmem:[%s128_s0] ss:$8 sm:%s2_s26]   ;;  %s85_s3 = smov 48   ;;  %s86_s4 = smov 32  }
   0x7   :  { %30 = vrot.lane.b32.xlu1 %v69_v3, %s84_s23  ;;  %5 = vst.msk [vmem:[#allocation0] ss:$8 sm:$0x3] %vm4_vm0, %v3_v6   ;;  %v72_v7 = vld [vmem:[%s128_s0 + $0x1] ss:$8 sm:%s49_s29]   ;;  %s87_s0 = smov 16  }
   0xa   :  { %37 = vrot.lane.b32.xlu0 %v70_v4, %s85_s3 }
   0xb   :  { %44 = vrot.lane.b32.xlu1 %v71_v5, %s86_s4 }
   0xe   :  { %51 = vrot.lane.b32.xlu0 %v72_v7, %s87_s0 }
  0x74   :  { %v10_v8 = vpop.permute.xlu0 %9  }
  0x75   :  { %12 = vst.msk [vmem:[#allocation0] ss:$8 sm:$0x3] %vm11_vm1, %v10_v8   ;;  %v24_v9 = vpop.permute.xlu1 %23  }
  0x78   :  { %v17_v10 = vpop.permute.xlu0 %16  }
  0x79   :  { %19 = vst.msk [vmem:[#allocation0] ss:$8 sm:$0x3] %vm18_vm2, %v17_v10   ;;  %v31_v11 = vpop.permute.xlu1 %30  }
  0x7a   :  { %26 = vst.msk [vmem:[#allocation0] ss:$8 sm:$0x3] %vm25_vm3, %v24_v9  }
  0x7b   :  { %33 = vst.msk [vmem:[#allocation0] ss:$8 sm:$0x3] %vm32_vm4, %v31_v11  }
  0x7c   :  { %v38_v12 = vpop.permute.xlu0 %37  }
  0x7d   :  { %40 = vst.msk [vmem:[#allocation0] ss:$8 sm:$0x3] %vm39_vm5, %v38_v12   ;;  %v45_v13 = vpop.permute.xlu1 %44  }
  0x7e   :  { %47 = vst.msk [vmem:[#allocation0] ss:$8 sm:$0x3] %vm46_vm6, %v45_v13  }
  0x80   :  { %v52_v14 = vpop.permute.xlu0 %51  }
  0x81   :  { %54 = vst.msk [vmem:[#allocation0] ss:$8 sm:$0x3] %vm53_vm7, %v52_v14  }
  0x88   :  { %v58_v15 = vld [vmem:[#allocation0] sm:$0x1]  ;;  %v62_v16 = vld [vmem:[#allocation0 + $0x8] sm:$0x1] }
  0x89   :  { %60 = vst [vmem:[%s129_s1] sm:$0x1] %v58_v15  ;;  %73 = vst [vmem:[%s129_s1 + $0x1] sm:$0x1] %v62_v16 }

// kernel: bottleneck_forward.1
= control target key start
LH: loop header
LB: loop body
LE: loop exit
PB: predicated region body
PF: predicated region fallthrough
CT: control target
= control target key end

     0   :  { %s1856_s13 = smov 0   ;;  %s2332_s0 = inlined_call_operand.vmem [shape: f32[128,256], index: 0, kind: input, shape index: {}]   ;;  %s2333_s1 = inlined_call_operand.vmem [shape: bf16[256,128], index: 1, kind: input, shape index: {}]   ;;  %s2334_s2 = inlined_call_operand.vmem [shape: f32[1,128], index: 2, kind: input, shape index: {}]   ;;  %s2335_s3 = inlined_call_operand.vmem [shape: f32[1,128], index: 3, kind: input, shape index: {}]   ;;  %s2336_s4 = inlined_call_operand.vmem [shape: bf16[384,128], index: 4, kind: input, shape index: {}]   ;;  %s2337_s5 = inlined_call_operand.vmem [shape: f32[1,128], index: 5, kind: input, shape index: {}]   ;;  %s2338_s6 = inlined_call_operand.vmem [shape: f32[1,128], index: 6, kind: input, shape index: {}]   ;;  %s2339_s7 = inlined_call_operand.vmem [shape: bf16[128,256], index: 7, kind: input, shape index: {}]   ;;  %s2340_s8 = inlined_call_operand.vmem [shape: f32[1,256], index: 8, kind: input, shape index: {}]   ;;  %s2341_s9 = inlined_call_operand.vmem [shape: f32[1,256], index: 9, kind: input, shape index: {}]   ;;  %s2342_s10 = inlined_call_operand.vmem [shape: f32[128,256], index: 10, kind: output, shape index: {}]  }
   0x1 LB: > { %s1502_s14 = sadd.s32 4294967295, %s1797_s13   ;;  %p1506_p0 = scmp.ge.s32.totalorder %s1797_s13, 1  ;;  %s1797_s13 = sphi %s1856_s13, %s20_s13  }
   0x2   : > { %p314_p1 = scmp.lt.s32.totalorder %s1797_s13, 3 }
   0x4   : > { %p315_p2 = pnand %p1506_p0, %p314_p1 }
   0x5   : > { %v1727_v0 = vld [vmem:[%s2333_s1 + $0x40] sm:$0xff] (!%p315_p2)   ;;  %s1507_s17 = sshll.u32 (!%p315_p2), %s1502_s14, 3  ;;  %v1729_v2 = vld [vmem:[%s2333_s1 + $0x48] sm:$0xff] (!%p315_p2)   ;;  %v1731_v4 = vld [vmem:[%s2333_s1 + $0x50] sm:$0xff] (!%p315_p2)   ;;  %vm1799_vm3 = vmmov (!%p315_p2), 1  }
   0x6   : > { %318 = sbr.rel (%p315_p2) target bundleno = 766 (0x2fe), region = 60  ;;  %v1728_v1 = vld [vmem:[%s2333_s1] sm:$0xff] (!%p315_p2)   ;;  %1601 = vmatprep.subr.bf16.mxu0 (!%p315_p2), %v1727_v0  ;;  %p355_p3 = scmp.lt.s32.totalorder (!%p315_p2), %s1507_s17, 15  ;;  %v1730_v3 = vld [vmem:[%s2333_s1 + $0x8] sm:$0xff] (!%p315_p2)   ;;  %v1732_v5 = vld [vmem:[%s2333_s1 + $0x10] sm:$0xff] (!%p315_p2)  }
   0x7   : > { %1602 = vmatpush3.bf16.msra.mxu0 (!%p315_p2), %v1728_v1  ;;  %v1733_v6 = vld [vmem:[%s2333_s1 + $0x58] sm:$0xff] (!%p315_p2)   ;;  %v1735_v8 = vld [vmem:[%s2333_s1 + $0x60] sm:$0xff] (!%p315_p2)   ;;  %v1737_v10 = vld [vmem:[%s2333_s1 + $0x68] sm:$0xff] (!%p315_p2)  }
   0x8   : > { %1603 = vmatprep.subr.bf16.mxu0 (!%p315_p2), %v1729_v2  ;;  %v1734_v7 = vld [vmem:[%s2333_s1 + $0x18] sm:$0xff] (!%p315_p2)   ;;  %v1736_v9 = vld [vmem:[%s2333_s1 + $0x20] sm:$0xff] (!%p315_p2)   ;;  %v1738_v14 = vld [vmem:[%s2333_s1 + $0x28] sm:$0xff] (!%p315_p2)  }
   0x9   : > { %v1739_v15 = vld [vmem:[%s2333_s1 + $0x70] sm:$0xff] (!%p315_p2)   ;;  %v1741_v17 = vld [vmem:[%s2333_s1 + $0x78] sm:$0xff] (!%p315_p2)   ;;  %v1743_v23 = vld [vmem:[%s2336_s4 + $0x80] sm:$0xff] (!%p315_p2)  }
   0xa   : > { %v1740_v16 = vld [vmem:[%s2333_s1 + $0x30] sm:$0xff] (!%p315_p2)   ;;  %v1742_v18 = vld [vmem:[%s2333_s1 + $0x38] sm:$0xff] (!%p315_p2)   ;;  %v1744_v41 = vld [vmem:[%s2336_s4 + $0x88] sm:$0xff] (!%p315_p2)  }
   0xb   : > { %1604 = vmatpush3.bf16.msra.mxu0 (!%p315_p2), %v1730_v3  ;;  %v1745_v42 = vld [vmem:[%s2336_s4 + $0x90] sm:$0xff] (!%p315_p2)   ;;  %v1746_v43 = vld [vmem:[%s2336_s4 + $0x40] sm:$0xff] (!%p315_p2)   ;;  %v1748_v45 = vld [vmem:[%s2336_s4 + $0x98] sm:$0xff] (!%p315_p2)  }
   0xc   : > { %1605 = vmatprep.subr.bf16.mxu0 (!%p315_p2), %v1731_v4  ;;  %v1747_v44 = vld [vmem:[%s2336_s4] sm:$0xff] (!%p315_p2)   ;;  %1641 = vmatprep.subr.bf16.mxu1 (!%p315_p2), %v1746_v43  ;;  %v1749_v46 = vld [vmem:[%s2336_s4 + $0x48] sm:$0xff] (!%p315_p2)   ;;  %v1752_v49 = vld [vmem:[%s2336_s4 + $0x50] sm:$0xff] (!%p315_p2)  }
   0xd   : > { %s2344_s17 = smov (!%p355_p3, %s1507_s17), 15  ;;  %1642 = vmatpush3.bf16.msra.mxu1 %v1747_v44  ;;  %v1750_v47 = vld [vmem:[%s2336_s4 + $0x8] sm:$0xff]   ;;  %v1751_v48 = vld [vmem:[%s2336_s4 + $0xa0] sm:$0xff]   ;;  %v1753_v50 = vld [vmem:[%s2336_s4 + $0x10] sm:$0xff]  }
   0xe   : > { %s1599_s30 = sshll.u32 %s2344_s17, 4  ;;  %1643 = vmatprep.subr.bf16.mxu1 %v1749_v46  ;;  %v1754_v51 = vld [vmem:[%s2336_s4 + $0xa8] sm:$0xff]   ;;  %v1755_v52 = vld [vmem:[%s2336_s4 + $0x58] sm:$0xff]   ;;  %v1757_v54 = vld [vmem:[%s2336_s4 + $0xb0] sm:$0xff]  }
   0xf   : > { %1606 = vmatpush3.bf16.msra.mxu0 %v1732_v5  ;;  %s1899_s19 = scalar_lea.vmem %s2332_s0, %s1599_s30  ;;  %v1756_v53 = vld [vmem:[%s2336_s4 + $0x18] sm:$0xff]   ;;  %v1758_v55 = vld [vmem:[%s2336_s4 + $0x60] sm:$0xff]   ;;  %v1761_v58 = vld [vmem:[%s2336_s4 + $0x68] sm:$0xff]   ;;  %s2271_s26 = scalar_lea.vmem %s2342_s10, %s1599_s30 }
  0x10   : > { %1607 = vmatprep.subr.bf16.mxu0 %v1733_v6  ;;  %v1908_v11 = vld [vmem:[%s1899_s19 + $0x8] sm:$0xff]  ;;  %v1911_v12 = vld [vmem:[%s1899_s19 + $0x18] sm:$0xff]  ;;  %v1931_v19 = vld [vmem:[%s1899_s19] sm:$0xff] }
  0x11   : > { %v386_v13 = vpack.c.bf16 %v1911_v12, %v1908_v11  ;;  %v1934_v20 = vld [vmem:[%s1899_s19 + $0x10] sm:$0xff]  ;;  %v1937_v21 = vld [vmem:[%s1899_s19 + $0x28] sm:$0xff]  ;;  %v1940_v22 = vld [vmem:[%s1899_s19 + $0x38] sm:$0xff]  ;;  %1644 = vmatpush3.bf16.msra.mxu1 %v1750_v47 }
  0x12   : > { %v385_v24 = vpack.c.bf16 %v1934_v20, %v1931_v19  ;;  %v388_v25 = vpack.c.bf16 %v1940_v22, %v1937_v21  ;;  %v1950_v26 = vld [vmem:[%s1899_s19 + $0x20] sm:$0xff]  ;;  %v1953_v27 = vld [vmem:[%s1899_s19 + $0x30] sm:$0xff]  ;;  %v1956_v28 = vld [vmem:[%s1899_s19 + $0x48] sm:$0xff]  ;;  %1645 = vmatprep.subr.bf16.mxu1 %v1752_v49 }
  0x13   : > { %1608 = vmatpush3.bf16.msra.mxu0 %v1734_v7  ;;  %553 = vmatprep.mubr.bf16.mxu0 %v386_v13  ;;  %v1959_v29 = vld [vmem:[%s1899_s19 + $0x58] sm:$0xff]  ;;  %v387_v30 = vpack.c.bf16 %v1953_v27, %v1950_v26  ;;  %v1966_v32 = vld [vmem:[%s1899_s19 + $0x40] sm:$0xff]  ;;  %v1969_v33 = vld [vmem:[%s1899_s19 + $0x50] sm:$0xff] }
  0x14   : > { %1609 = vmatprep.subr.bf16.mxu0 %v1735_v8  ;;  %v390_v31 = vpack.c.bf16 %v1959_v29, %v1956_v28  ;;  %v1972_v34 = vld [vmem:[%s1899_s19 + $0x68] sm:$0xff]  ;;  %v1975_v35 = vld [vmem:[%s1899_s19 + $0x78] sm:$0xff]  ;;  %v389_v36 = vpack.c.bf16 %v1969_v33, %v1966_v32  ;;  %v1982_v38 = vld [vmem:[%s1899_s19 + $0x60] sm:$0xff]  ;;  %v624_v8 = vlaneseq }
  0x15   : > { %v392_v37 = vpack.c.bf16 %v1975_v35, %v1972_v34  ;;  %v1985_v39 = vld [vmem:[%s1899_s19 + $0x70] sm:$0xff]  ;;  %1646 = vmatpush3.bf16.msra.mxu1 %v1753_v50  ;;  %v1759_v56 = vld [vmem:[%s2336_s4 + $0x20] sm:$0xff]   ;;  %v1760_v57 = vld [vmem:[%s2336_s4 + $0xb8] sm:$0xff]  }
  0x16   : > { %v391_v40 = vpack.c.bf16 %v1985_v39, %v1982_v38  ;;  %1647 = vmatprep.subr.bf16.mxu1 %v1755_v52  ;;  %v1762_v59 = vld [vmem:[%s2336_s4 + $0x28] sm:$0xff]   ;;  %v1763_v60 = vld [vmem:[%s2336_s4 + $0x70] sm:$0xff]   ;;  %v1765_v62 = vld [vmem:[%s2336_s4 + $0x78] sm:$0xff]  }
  0x17   : > { %1610 = vmatpush3.bf16.msra.mxu0 %v1736_v9  ;;  %v1764_v61 = vld [vmem:[%s2336_s4 + $0x30] sm:$0xff]   ;;  %v1766_v63 = vld [vmem:[%s2336_s4 + $0x38] sm:$0xff]   ;;  %v1769_v0 = vld [vmem:[%s2339_s7 + $0x4] ss:$8 sps:$4 sm:$0xff]  }
  0x18   : > { %1611 = vmatprep.subr.bf16.mxu0 %v1737_v10  ;;  %v2064_v3 = vld [vmem:[%s2334_s2] ss:$0 sm:$0xff] }
  0x19   : > { %1648 = vmatpush3.bf16.msra.mxu1 %v1756_v53  ;;  %v2069_v6 = vld [vmem:[%s2335_s3] ss:$0 sm:$0xff] }
  0x1a   : > { %1649 = vmatprep.subr.bf16.mxu1 %v1758_v55 }
  0x1b   : > { %1612 = vmatpush3.bf16.msra.mxu0 %v1738_v14 }
  0x1c   : > { %1613 = vmatprep.subr.bf16.mxu0 %v1739_v15  ;;  %v2074_v15 = vshrl.u32 %v624_v8, 7 }
  0x1d   : > { %1650 = vmatpush3.bf16.msra.mxu1 %v1759_v56 }
  0x1e   : > { %1651 = vmatprep.subr.bf16.mxu1 %v1761_v58  ;;  %vm778_vm0 = vcmp.lt.s32.totalorder %v2074_v15, 7  ;;  %vm745_vm1 = vcmp.lt.s32.totalorder %v2074_v15, 1  ;;  %v628_v55 = vadd.s32 24, %v2074_v15 }
  0x1f   : > { %1614 = vmatpush3.bf16.msra.mxu0 %v1740_v16 }
  0x20   : > { %1615 = vmatprep.subr.bf16.mxu0 %v1741_v17 }
  0x21   : > { %1652 = vmatpush3.bf16.msra.mxu1 %v1762_v59 }
  0x22   : > { %1653 = vmatprep.subr.bf16.mxu1 %v1763_v60 }
  0x23   : > { %1616 = vmatpush3.bf16.msra.mxu0 %v1742_v18 }
  0x24   : > { %1693 = vmatprep.subr.bf16.mxu0 %v1743_v23 }
  0x25   : > { %1654 = vmatpush3.bf16.msra.mxu1 %v1764_v61 }
  0x26   : > { %554 = vmatmul.mubr.bf16.vlgmr.msra.gmra.mrb[0].mxu0 %v385_v24  ;;  %1655 = vmatprep.subr.bf16.mxu1 %v1765_v62  ;;  %v626_v24 = vadd.s32 8, %v2074_v15 }
  0x27   : > { %561 = vmatprep.mubr.bf16.mxu0 %v388_v25  ;;  %1694 = vmatpush3.bf16.msra.mxu0 %v1743_v23 }
  0x28   : > { %1695 = vmatprep.subr.bf16.mxu0 %v1744_v41  ;;  %v644_v46 = vand.u32 15, %v626_v24 }
  0x29   : > { %1656 = vmatpush3.bf16.msra.mxu1 %v1766_v63 }
  0x2a   : > { %1267 = vmatprep.subr.bf16.mxu1 %v1769_v0  ;;  %vm763_vm2 = vcmp.ne.s32.totalorder %v644_v46, 15  ;;  %v632_v46 = vadd.s32 56, %v2074_v15 }
  0x2b   : > { %1696 = vmatpush3.bf16.msra.mxu0 %v1744_v41  ;;  %vm1567_vm4 = vmpackc.low %vm763_vm2, %vm1799_vm3 }
  0x2c   : > { %1697 = vmatprep.subr.bf16.mxu0 %v1745_v42 }
  0x2e   : > { %562 = vmatmul.mubr.bf16.gmra.mrb[4].mxu0 %v387_v30 }
  0x2f   : > { %569 = vmatprep.mubr.bf16.mxu0 %v390_v31  ;;  %1698 = vmatpush3.bf16.msra.mxu0 %v1745_v42 }
  0x30   : > { %1699 = vmatprep.subr.bf16.mxu0 %v1748_v45 }
  0x33   : > { %1700 = vmatpush3.bf16.msra.mxu0 %v1748_v45 }
  0x34   : > { %1701 = vmatprep.subr.bf16.mxu0 %v1751_v48 }
  0x36   : > { %570 = vmatmul.mubr.bf16.gmra.mrb[8].mxu0 %v389_v36 }
  0x37   : > { %577 = vmatprep.mubr.bf16.mxu0 %v392_v37  ;;  %1702 = vmatpush3.bf16.msra.mxu0 %v1751_v48 }
  0x38   : > { %1703 = vmatprep.subr.bf16.mxu0 %v1754_v51 }
  0x3b   : > { %1704 = vmatpush3.bf16.msra.mxu0 %v1754_v51 }
  0x3c   : > { %1705 = vmatprep.subr.bf16.mxu0 %v1757_v54 }
  0x3e   : > { %578 = vmatmul.mubr.bf16.gmra.mrb[12].mxu0 %v391_v40 }
  0x3f   : > { %1706 = vmatpush3.bf16.msra.mxu0 %v1757_v54 }
  0x40   : > { %1707 = vmatprep.subr.bf16.mxu0 %v1760_v57 }
  0x43   : > { %1708 = vmatpush3.bf16.msra.mxu0 %v1760_v57 }
  0xf9   : > { %v1617_v1 = vpop.f32.mrb[0].mxu0 }
  0xfa   : > { %v1618_v2 = vpop.f32.mrb[1].mxu0 }
  0xfb   : > { %v1619_v4 = vadd.f32 %v1618_v2, %v1617_v1  ;;  %v1620_v5 = vpop.f32.mrb[2].mxu0 }
  0xfc   : > { %v1621_v7 = vpop.f32.mrb[3].mxu0 }
  0xfd   : > { %v593_v9 = vmul.f32 %v1619_v4, %v2064_v3  ;;  %v1622_v10 = vadd.f32 %v1621_v7, %v1620_v5  ;;  %v658_v4 = vand.u32 15, %v628_v55 }
  0xff   : > { %v608_v13 = vadd.f32 %v2069_v6, %v593_v9  ;;  %v594_v14 = vmul.f32 %v1622_v10, %v2064_v3  ;;  %vm765_vm5 = vcmp.ne.s32.totalorder %v658_v4, 15 }
 0x100   : > { %vm1570_vm6 = vmpackc.low %vm765_vm5, %vm1799_vm3 }
 0x101   : > { %v609_v16 = vadd.f32 %v2069_v6, %v594_v14  ;;  %v1623_v17 = vpop.f32.mrb[4].mxu0  ;;  %v2077_v18 = vmax.f32 %v608_v13, 0.0  ;;  %v630_v14 = vadd.s32 40, %v2074_v15 }
 0x102   : > { %v1624_v23 = vpop.f32.mrb[5].mxu0 }
 0x103   : > { %v1625_v25 = vadd.f32 %v1624_v23, %v1623_v17  ;;  %v1626_v30 = vpop.f32.mrb[6].mxu0  ;;  %v617_v31 = vmax.f32 %v609_v16, 0.0  ;;  %v737_v37 = vrot.slane %v2077_v18, 7  ;;  %v770_v40 = vrot.slane %v2077_v18, 1 }
 0x104   : > { %v1627_v36 = vpop.f32.mrb[7].mxu0 }
 0x105   : > { %v595_v41 = vmul.f32 %v1625_v25, %v2064_v3  ;;  %v1628_v42 = vadd.f32 %v1627_v36, %v1626_v30  ;;  %v738_v43 = vrot.slane %v617_v31, 7  ;;  %v771_v44 = vrot.slane %v617_v31, 1 }
 0x106   : > { %v796_v45 = vpack.c.bf16 %v617_v31, %v2077_v18  ;;  %v1772_v18 = vld [vmem:[%s2339_s7 + $0x14] ss:$8 sps:$4 sm:$0xff]  }
 0x107   : > { %v610_v47 = vadd.f32 %v2069_v6, %v595_v41  ;;  %v596_v48 = vmul.f32 %v1628_v42, %v2064_v3  ;;  %v785_v49 = vsel %vm778_vm0, %v770_v40, %v771_v44  ;;  %v2096_v50 = vsel %vm745_vm1, %v737_v37, %v738_v43 }
 0x108   : > { %1031 = vmatprep.mubr.bf16.mxu1 %v796_v45  ;;  %v672_v45 = vand.u32 15, %v630_v14 }
 0x109   : > { %v2098_v51 = vmax.f32 %v610_v47, 0.0  ;;  %v611_v52 = vadd.f32 %v2069_v6, %v596_v48  ;;  %v1629_v53 = vpop.f32.mrb[8].mxu0 }
 0x10a   : > { %v1630_v54 = vpop.f32.mrb[9].mxu0  ;;  %vm767_vm7 = vcmp.ne.s32.totalorder %v672_v45, 15 }
 0x10b   : > { %v739_v56 = vrot.slane %v2098_v51, 7  ;;  %v772_v57 = vrot.slane %v2098_v51, 1  ;;  %v2104_v58 = vmax.f32 %v611_v52, 0.0  ;;  %v1631_v59 = vadd.f32 %v1630_v54, %v1629_v53  ;;  %v1632_v60 = vpop.f32.mrb[10].mxu0  ;;  %vm1573_vm9 = vmpackc.low %vm767_vm7, %vm1799_vm3 }
 0x10c   : > { %v1633_v61 = vpop.f32.mrb[11].mxu0 }
 0x10d   : > { %v740_v62 = vrot.slane %v2104_v58, 7  ;;  %v773_v63 = vrot.slane %v2104_v58, 1  ;;  %v597_v0 = vmul.f32 %v1631_v59, %v2064_v3  ;;  %v1634_v1 = vadd.f32 %v1633_v61, %v1632_v60 }
 0x10e   : > { %v784_v2 = vsel %vm778_vm0, %v771_v44, %v772_v57  ;;  %v799_v5 = vpack.c.bf16 %v2104_v58, %v2098_v51  ;;  %v2116_v7 = vsel %vm745_vm1, %v738_v43, %v739_v56  ;;  %v631_v51 = vadd.s32 48, %v2074_v15 }
 0x10f   : > { %v783_v8 = vsel %vm778_vm0, %v772_v57, %v773_v63  ;;  %v612_v9 = vadd.f32 %v2069_v6, %v597_v0  ;;  %v598_v10 = vmul.f32 %v1634_v1, %v2064_v3  ;;  %v1568_v13 = vpack.c.bf16 %v784_v2, %v785_v49 }
 0x110   : > { %v2125_v16 = vsel %vm745_vm1, %v739_v56, %v740_v62  ;;  %v686_v2 = vand.u32 15, %v632_v46  ;;  %v679_v58 = vand.u32 15, %v631_v51  ;;  %v1781_v46 = vld [vmem:[%s2339_s7 + $0x44] ss:$8 sps:$4 sm:$0xff]  }
 0x111   : > { %v2127_v17 = vmax.f32 %v612_v9, 0.0  ;;  %v613_v23 = vadd.f32 %v2069_v6, %v598_v10  ;;  %1709 = vmatprep.mubr.msk.bf16.mxu0 %vm1567_vm4, %v1568_v13  ;;  %v1635_v24 = vpop.f32.mrb[12].mxu0  ;;  %v1559_v25 = vpack.c.bf16 %v2125_v16, %v2116_v7  ;;  %v1775_v7 = vld [vmem:[%s2339_s7 + $0x24] ss:$8 sps:$4 sm:$0xff]   ;;  %v1778_v16 = vld [vmem:[%s2339_s7 + $0x34] ss:$8 sps:$4 sm:$0xff]  }
 0x112   : > { %v1636_v30 = vpop.f32.mrb[13].mxu0  ;;  %vm769_vm10 = vcmp.ne.s32.totalorder %v686_v2, 15 }
 0x113   : > { %v741_v31 = vrot.slane %v2127_v17, 7  ;;  %v774_v36 = vrot.slane %v2127_v17, 1  ;;  %v2134_v41 = vmax.f32 %v613_v23, 0.0  ;;  %v1637_v42 = vadd.f32 %v1636_v30, %v1635_v24  ;;  %v1638_v43 = vpop.f32.mrb[14].mxu0  ;;  %vm1576_vm12 = vmpackc.low %vm769_vm10, %vm1799_vm3 }
 0x114   : > { %v1639_v44 = vpop.f32.mrb[15].mxu0 }
 0x115   : > { %v782_v47 = vsel %vm778_vm0, %v773_v63, %v774_v36  ;;  %v742_v48 = vrot.slane %v2134_v41, 7  ;;  %v775_v49 = vrot.slane %v2134_v41, 1  ;;  %v599_v52 = vmul.f32 %v1637_v42, %v2064_v3 }
 0x116   : > { %v1571_v53 = vpack.c.bf16 %v782_v47, %v783_v8  ;;  %v1640_v54 = vadd.f32 %v1639_v44, %v1638_v43  ;;  %v802_v55 = vpack.c.bf16 %v2134_v41, %v2127_v17  ;;  %v749_v56 = vsel %vm745_vm1, %v740_v62, %v741_v31  ;;  %v1767_v41 = vld [vmem:[%s2339_s7] ss:$8 sps:$4 sm:$0xff]  }
 0x117   : > { %v614_v57 = vadd.f32 %v2069_v6, %v599_v52  ;;  %v781_v59 = vsel %vm778_vm0, %v774_v36, %v775_v49  ;;  %v748_v60 = vsel %vm745_vm1, %v741_v31, %v742_v48  ;;  %v637_v63 = vand.u32 15, %v2074_v15  ;;  %v1779_v47 = vld [vmem:[%s2339_s7 + $0x40] ss:$8 sps:$4 sm:$0xff]   ;;  %v1787_v52 = vld [vmem:[%s2339_s7 + $0x64] ss:$8 sps:$4 sm:$0xff]  }
 0x118   : > { %v600_v61 = vmul.f32 %v1640_v54, %v2064_v3  ;;  %1710 = vmatmul.mubr.msk.bf16.vlgmr.msra.gmra.mrb[16].mxu0 %vm1570_vm6, %v1571_v53  ;;  %v1562_v0 = vpack.c.bf16 %v748_v60, %v749_v56  ;;  %v627_v3 = vadd.s32 16, %v2074_v15  ;;  %v1785_v53 = vld [vmem:[%s2339_s7 + $0x60] ss:$8 sps:$4 sm:$0xff]   ;;  %v1790_v54 = vld [vmem:[%s2339_s7 + $0x74] ss:$8 sps:$4 sm:$0xff]   ;;  %v1800_v56 = vmov 0  }
 0x119   : > { %v622_v1 = vmax.f32 %v614_v57, 0.0  ;;  %vm729_vm8 = vcmp.ne.s32.totalorder %v637_v63, 0 }
 0x11a   : > { %v615_v4 = vadd.f32 %v2069_v6, %v600_v61  ;;  %vm1555_vm11 = vmpackc.low %vm1799_vm3, %vm729_vm8  ;;  %v651_v43 = vand.u32 15, %v627_v3 }
 0x11b   : > { %v743_v62 = vrot.slane %v622_v1, 7  ;;  %v776_v8 = vrot.slane %v622_v1, 1 }
 0x11c   : > { %v623_v9 = vmax.f32 %v615_v4, 0.0  ;;  %vm731_vm13 = vcmp.ne.s32.totalorder %v651_v43, 0 }
 0x11d   : > { %v780_v10 = vsel %vm778_vm0, %v775_v49, %v776_v8  ;;  %v747_v13 = vsel %vm745_vm1, %v742_v48, %v743_v62  ;;  %vm1558_vm14 = vmpackc.low %vm1799_vm3, %vm731_vm13  ;;  %v1784_v48 = vld [vmem:[%s2339_s7 + $0x54] ss:$8 sps:$4 sm:$0xff]   ;;  %v1782_v49 = vld [vmem:[%s2339_s7 + $0x50] ss:$8 sps:$4 sm:$0xff]  }
 0x11e   : > { %v744_v14 = vrot.slane %v623_v9, 7  ;;  %v777_v17 = vrot.slane %v623_v9, 1  ;;  %v1574_v23 = vpack.c.bf16 %v780_v10, %v781_v59  ;;  %v805_v6 = vpack.c.bf16 %v623_v9, %v622_v1  ;;  %v1579_v9 = vld [vmem:[%s2337_s5] ss:$0 sm:$0xff] }
 0x120   : > { %1713 = vmatprep.mubr.msk.bf16.mxu0 %vm1573_vm9, %v1574_v23  ;;  %v753_v24 = vsel %vm745_vm1, %v744_v14, %v737_v37  ;;  %v779_v30 = vsel %vm778_vm0, %v776_v8, %v777_v17  ;;  %v786_v31 = vsel %vm778_vm0, %v777_v17, %v770_v40  ;;  %v746_v36 = vsel %vm745_vm1, %v743_v62, %v744_v14  ;;  %v1770_v40 = vld [vmem:[%s2339_s7 + $0x10] ss:$8 sps:$4 sm:$0xff]   ;;  %v1580_v17 = vld [vmem:[%s2338_s6] ss:$0 sm:$0xff] }
 0x121   : > { %v1556_v42 = vpack.c.bf16 %v2096_v50, %v753_v24  ;;  %v1577_v37 = vpack.c.bf16 %v786_v31, %v779_v30  ;;  %v1565_v44 = vpack.c.bf16 %v746_v36, %v747_v13  ;;  %v629_v50 = vadd.s32 32, %v2074_v15 }
 0x122   : > { %vm735_vm1 = vcmp.ne.s32.totalorder %v679_v58, 0 }
 0x123   : > { %1557 = vmatmul.mubr.msk.bf16.vlgmr.msra.gmra.mrb[0].mxu1 %vm1555_vm11, %v1556_v42  ;;  %1714 = vmatmul.mubr.msk.bf16.gmra.mrb[20].mxu0 %vm1576_vm12, %v1577_v37  ;;  %v665_v45 = vand.u32 15, %v629_v50  ;;  %vm1564_vm2 = vmpackc.low %vm1799_vm3, %vm735_vm1 }
 0x124   : > { %1039 = vmatprep.mubr.bf16.mxu1 %v799_v5  ;;  %1268 = vmatpush1.bf16.msra.mxu1 %v1767_v41  ;;  %v1773_v5 = vld [vmem:[%s2339_s7 + $0x20] ss:$8 sps:$4 sm:$0xff]  }
 0x125   : > { %1269 = vmatprep.subr.bf16.mxu1 %v1772_v18  ;;  %vm733_vm15 = vcmp.ne.s32.totalorder %v665_v45, 0 }
 0x126   : > { %vm1561_vm0 = vmpackc.low %vm1799_vm3, %vm733_vm15 }
 0x128   : > { %1270 = vmatpush1.bf16.msra.mxu1 %v1770_v40 }
 0x129   : > { %1271 = vmatprep.subr.bf16.mxu1 %v1775_v7 }
 0x12b   : > { %1560 = vmatmul.mubr.msk.bf16.gmra.mrb[4].mxu1 %vm1558_vm14, %v1559_v25  ;;  %v1776_v25 = vld [vmem:[%s2339_s7 + $0x30] ss:$8 sps:$4 sm:$0xff]  }
 0x12c   : > { %1047 = vmatprep.mubr.bf16.mxu1 %v802_v55  ;;  %1272 = vmatpush1.bf16.msra.mxu1 %v1773_v5  ;;  %v1788_v55 = vld [vmem:[%s2339_s7 + $0x70] ss:$8 sps:$4 sm:$0xff]  }
 0x12d   : > { %1273 = vmatprep.subr.bf16.mxu1 %v1778_v16 }
 0x130   : > { %1274 = vmatpush1.bf16.msra.mxu1 %v1776_v25 }
 0x131   : > { %1275 = vmatprep.subr.bf16.mxu1 %v1781_v46 }
 0x133   : > { %1563 = vmatmul.mubr.msk.bf16.gmra.mrb[8].mxu1 %vm1561_vm0, %v1562_v0 }
 0x134   : > { %1055 = vmatprep.mubr.bf16.mxu1 %v805_v6  ;;  %1276 = vmatpush1.bf16.msra.mxu1 %v1779_v47 }
 0x135   : > { %1277 = vmatprep.subr.bf16.mxu1 %v1784_v48 }
 0x138   : > { %1278 = vmatpush1.bf16.msra.mxu1 %v1782_v49 }
 0x139   : > { %1279 = vmatprep.subr.bf16.mxu1 %v1787_v52 }
 0x13b   : > { %1566 = vmatmul.mubr.msk.bf16.gmra.mrb[12].mxu1 %vm1564_vm2, %v1565_v44 }
 0x13c   : > { %1280 = vmatpush1.bf16.msra.mxu1 %v1785_v53  ;;  %1299 = vmatprep.mubr.bf16.mxu1 %v1800_v56 }
 0x13d   : > { %1281 = vmatprep.subr.bf16.mxu1 %v1790_v54 }
 0x140   : > { %1282 = vmatpush1.bf16.msra.mxu1 %v1788_v55 }
 0x1eb   : > { %v1711_v57 = vpop.f32.mrb[16].mxu0 }
 0x1ec   : > { %v1098_v59 = vpop.f32.mrb[17].mxu0 }
 0x1ed   : > { %v1712_v60 = vpop.f32.mrb[18].mxu0 }
 0x1ee   : > { %v1101_v61 = vpop.f32.mrb[19].mxu0 }
 0x1f6   : > { %v1657_v63 = vpop.f32.mrb[0].mxu1  ;;  %v1715_v0 = vpop.f32.mrb[20].mxu0 }
 0x1f7   : > { %v1658_v1 = vpop.f32.mrb[1].mxu1  ;;  %v1114_v2 = vpop.f32.mrb[21].mxu0 }
 0x1f8   : > { %v1659_v4 = vadd.f32 %v1658_v1, %v1657_v63  ;;  %v1660_v62 = vpop.f32.mrb[2].mxu1  ;;  %v1716_v8 = vpop.f32.mrb[22].mxu0 }
 0x1f9   : > { %v1661_v10 = vpop.f32.mrb[3].mxu1  ;;  %v1117_v3 = vpop.f32.mrb[23].mxu0 }
 0x1fa   : > { %v1099_v13 = vadd.f32 %v1659_v4, %v1098_v59  ;;  %v1662_v14 = vadd.f32 %v1661_v10, %v1660_v62 }
 0x1fc   : > { %v1136_v23 = vmul.f32 %v1579_v9, %v1099_v13  ;;  %v1102_v6 = vadd.f32 %v1662_v14, %v1101_v61 }
 0x1fe   : > { %v1151_v24 = vadd.f32 %v1580_v17, %v1136_v23  ;;  %v1137_v30 = vmul.f32 %v1579_v9, %v1102_v6  ;;  %v1663_v31 = vpop.f32.mrb[4].mxu1 }
 0x1ff   : > { %v1664_v36 = vpop.f32.mrb[5].mxu1 }
 0x200   : > { %v1152_v41 = vadd.f32 %v1580_v17, %v1137_v30  ;;  %v1665_v42 = vadd.f32 %v1664_v36, %v1663_v31  ;;  %v1666_v37 = vpop.f32.mrb[6].mxu1  ;;  %v1159_v44 = vmax.f32 %v1151_v24, 0.0 }
 0x201   : > { %v1667_v43 = vpop.f32.mrb[7].mxu1 }
 0x202   : > { %v1160_v18 = vmax.f32 %v1152_v41, 0.0  ;;  %v1107_v40 = vadd.f32 %v1711_v57, %v1665_v42  ;;  %v1668_v50 = vadd.f32 %v1667_v43, %v1666_v37 }
 0x204   : > { %v1167_v45 = vpack.c.bf16 %v1160_v18, %v1159_v44  ;;  %v1138_v51 = vmul.f32 %v1579_v9, %v1107_v40  ;;  %v1110_v58 = vadd.f32 %v1712_v60, %v1668_v50  ;;  %v1344_v18 = vsub.s32 0, %v2074_v15 }
 0x205   : > { %v1348_v40 = vsub.s32 1, %v2074_v15 }
 0x206   : > { %v1139_v5 = vmul.f32 %v1579_v9, %v1110_v58  ;;  %v1669_v7 = vpop.f32.mrb[8].mxu1  ;;  %1300 = vmatmul.mubr.bf16.vlgmr.msra.gmra.mrb[16].mxu1 %v1167_v45  ;;  %v1153_v16 = vadd.f32 %v1580_v17, %v1138_v51 }
 0x207   : > { %v1670_v25 = vpop.f32.mrb[9].mxu1  ;;  %1309 = vmatprep.mubr.bf16.mxu1 %v1800_v56 }
 0x208   : > { %v1671_v46 = vadd.f32 %v1670_v25, %v1669_v7  ;;  %v1672_v47 = vpop.f32.mrb[10].mxu1  ;;  %v1154_v48 = vadd.f32 %v1580_v17, %v1139_v5  ;;  %v1161_v54 = vmax.f32 %v1153_v16, 0.0 }
 0x209   : > { %v1673_v49 = vpop.f32.mrb[11].mxu1 }
 0x20a   : > { %v1115_v52 = vadd.f32 %v1671_v46, %v1114_v2  ;;  %v1674_v53 = vadd.f32 %v1673_v49, %v1672_v47  ;;  %v1162_v55 = vmax.f32 %v1154_v48, 0.0 }
 0x20c   : > { %v1140_v57 = vmul.f32 %v1579_v9, %v1115_v52  ;;  %v1118_v59 = vadd.f32 %v1674_v53, %v1117_v3  ;;  %v1168_v61 = vpack.c.bf16 %v1162_v55, %v1161_v54 }
 0x20e   : > { %v1141_v63 = vmul.f32 %v1579_v9, %v1118_v59  ;;  %v1675_v60 = vpop.f32.mrb[12].mxu1  ;;  %1310 = vmatmul.mubr.bf16.gmra.mrb[20].mxu1 %v1168_v61  ;;  %v1155_v1 = vadd.f32 %v1580_v17, %v1140_v57 }
 0x20f   : > { %v1676_v4 = vpop.f32.mrb[13].mxu1  ;;  %1319 = vmatprep.mubr.bf16.mxu1 %v1800_v56 }
 0x210   : > { %v1677_v62 = vadd.f32 %v1676_v4, %v1675_v60  ;;  %v1678_v10 = vpop.f32.mrb[14].mxu1  ;;  %v1156_v13 = vadd.f32 %v1580_v17, %v1141_v63  ;;  %v1163_v2 = vmax.f32 %v1155_v1, 0.0 }
 0x211   : > { %v1679_v14 = vpop.f32.mrb[15].mxu1 }
 0x212   : > { %v1123_v23 = vadd.f32 %v1715_v0, %v1677_v62  ;;  %v1680_v6 = vadd.f32 %v1679_v14, %v1678_v10  ;;  %v1164_v24 = vmax.f32 %v1156_v13, 0.0  ;;  %v1340_v0 = vld [vmem:[%s2340_s8] sm:$0x3] }
 0x214   : > { %v1142_v30 = vmul.f32 %v1579_v9, %v1123_v23  ;;  %v1126_v31 = vadd.f32 %v1716_v8, %v1680_v6  ;;  %v1169_v36 = vpack.c.bf16 %v1164_v24, %v1163_v2  ;;  %v1368_v8 = vld [vmem:[%s2341_s9] sm:$0x3] }
 0x215   : > { %v2256_v45 = vrot.slane %v1368_v8, %v1348_v40 }
 0x216   : > { %v1143_v3 = vmul.f32 %v1579_v9, %v1126_v31  ;;  %1320 = vmatmul.mubr.bf16.gmra.mrb[24].mxu1 %v1169_v36  ;;  %v1157_v41 = vadd.f32 %v1580_v17, %v1142_v30  ;;  %v2250_v9 = vrot.slane %v1340_v0, %v1344_v18 }
 0x217   : > { %1329 = vmatprep.mubr.bf16.mxu1 %v1800_v56  ;;  %v2252_v56 = vrot.slane %v1340_v0, %v1348_v40 }
 0x218   : > { %v1158_v42 = vadd.f32 %v1580_v17, %v1143_v3  ;;  %v1165_v37 = vmax.f32 %v1157_v41, 0.0  ;;  %v2254_v17 = vrot.slane %v1368_v8, %v1344_v18 }
 0x21a   : > { %v1166_v43 = vmax.f32 %v1158_v42, 0.0 }
 0x21c   : > { %v1170_v44 = vpack.c.bf16 %v1166_v43, %v1165_v37 }
 0x21e   : > { %1330 = vmatmul.mubr.bf16.gmra.mrb[28].mxu1 %v1170_v44 }
 0x2d9   : > { %v1301_v50 = vpop.f32.mrb[16].mxu1 }
 0x2da   : > { %v1352_v51 = vmul.f32 %v2250_v9, %v1301_v50  ;;  %v1303_v58 = vpop.f32.mrb[17].mxu1 }
 0x2db   : > { %v1353_v5 = vmul.f32 %v2252_v56, %v1303_v58  ;;  %v1305_v15 = vpop.f32.mrb[18].mxu1 }
 0x2dc   : > { %v1380_v7 = vadd.f32 %v2254_v17, %v1352_v51  ;;  %v1354_v16 = vmul.f32 %v2250_v9, %v1305_v15  ;;  %v1307_v25 = vpop.f32.mrb[19].mxu1 }
 0x2dd   : > { %v1381_v46 = vadd.f32 %v2256_v45, %v1353_v5  ;;  %v1355_v47 = vmul.f32 %v2252_v56, %v1307_v25 }
 0x2de   : > { %v1396_v48 = vadd.f32 %v1380_v7, %v1931_v19  ;;  %v1382_v49 = vadd.f32 %v2254_v17, %v1354_v16 }
 0x2df   : > { %v1397_v52 = vadd.f32 %v1381_v46, %v1908_v11  ;;  %v1383_v53 = vadd.f32 %v2256_v45, %v1355_v47 }
 0x2e0   : > { %v1412_v54 = vmax.f32 %v1396_v48, 0.0  ;;  %v1398_v55 = vadd.f32 %v1382_v49, %v1934_v20 }
 0x2e1   : > { %v1413_v19 = vmax.f32 %v1397_v52, 0.0  ;;  %v1399_v57 = vadd.f32 %v1383_v53, %v1911_v12  ;;  %v1311_v59 = vpop.f32.mrb[20].mxu1 }
 0x2e2   : > { %1428 = vst [vmem:[%s2271_s26] sm:$0xff] %v1412_v54  ;;  %v1414_v61 = vmax.f32 %v1398_v55, 0.0  ;;  %v1356_v63 = vmul.f32 %v2250_v9, %v1311_v59  ;;  %v1313_v60 = vpop.f32.mrb[21].mxu1 }
 0x2e3   : > { %1429 = vst [vmem:[%s2271_s26 + $0x8] sm:$0xff] %v1413_v19  ;;  %v1415_v1 = vmax.f32 %v1399_v57, 0.0  ;;  %v1357_v4 = vmul.f32 %v2252_v56, %v1313_v60  ;;  %v1315_v11 = vpop.f32.mrb[22].mxu1 }
 0x2e4   : > { %1430 = vst [vmem:[%s2271_s26 + $0x10] sm:$0xff] %v1414_v61  ;;  %v1384_v62 = vadd.f32 %v2254_v17, %v1356_v63  ;;  %v1358_v20 = vmul.f32 %v2250_v9, %v1315_v11  ;;  %v1317_v10 = vpop.f32.mrb[23].mxu1 }
 0x2e5   : > { %1431 = vst [vmem:[%s2271_s26 + $0x18] sm:$0xff] %v1415_v1  ;;  %v1385_v12 = vadd.f32 %v2256_v45, %v1357_v4  ;;  %v1359_v13 = vmul.f32 %v2252_v56, %v1317_v10 }
 0x2e6   : > { %v1400_v14 = vadd.f32 %v1384_v62, %v1950_v26  ;;  %v1386_v23 = vadd.f32 %v2254_v17, %v1358_v20 }
 0x2e7   : > { %v1401_v6 = vadd.f32 %v1385_v12, %v1937_v21  ;;  %v1387_v2 = vadd.f32 %v2256_v45, %v1359_v13 }
 0x2e8   : > { %v1416_v24 = vmax.f32 %v1400_v14, 0.0  ;;  %v1402_v30 = vadd.f32 %v1386_v23, %v1953_v27 }
 0x2e9   : > { %v1417_v31 = vmax.f32 %v1401_v6, 0.0  ;;  %v1403_v36 = vadd.f32 %v1387_v2, %v1940_v22  ;;  %v1321_v3 = vpop.f32.mrb[24].mxu1 }
 0x2ea   : > { %1432 = vst [vmem:[%s2271_s26 + $0x20] sm:$0xff] %v1416_v24  ;;  %v1418_v41 = vmax.f32 %v1402_v30, 0.0  ;;  %v1360_v42 = vmul.f32 %v2250_v9, %v1321_v3  ;;  %v1323_v26 = vpop.f32.mrb[25].mxu1 }
 0x2eb   : > { %1433 = vst [vmem:[%s2271_s26 + $0x28] sm:$0xff] %v1417_v31  ;;  %v1419_v37 = vmax.f32 %v1403_v36, 0.0  ;;  %v1361_v43 = vmul.f32 %v2252_v56, %v1323_v26  ;;  %v1325_v21 = vpop.f32.mrb[26].mxu1 }
 0x2ec   : > { %1434 = vst [vmem:[%s2271_s26 + $0x30] sm:$0xff] %v1418_v41  ;;  %v1388_v44 = vadd.f32 %v2254_v17, %v1360_v42  ;;  %v1362_v27 = vmul.f32 %v2250_v9, %v1325_v21  ;;  %v1327_v18 = vpop.f32.mrb[27].mxu1 }
 0x2ed   : > { %1435 = vst [vmem:[%s2271_s26 + $0x38] sm:$0xff] %v1419_v37  ;;  %v1389_v22 = vadd.f32 %v2256_v45, %v1361_v43  ;;  %v1363_v0 = vmul.f32 %v2252_v56, %v1327_v18 }
 0x2ee   : > { %v1404_v40 = vadd.f32 %v1388_v44, %v1966_v32  ;;  %v1390_v8 = vadd.f32 %v2254_v17, %v1362_v27 }
 0x2ef   : > { %v1405_v50 = vadd.f32 %v1389_v22, %v1956_v28  ;;  %v1391_v51 = vadd.f32 %v2256_v45, %v1363_v0 }
 0x2f0   : > { %v1420_v58 = vmax.f32 %v1404_v40, 0.0  ;;  %v1406_v5 = vadd.f32 %v1390_v8, %v1969_v33 }
 0x2f1   : > { %v1421_v15 = vmax.f32 %v1405_v50, 0.0  ;;  %v1407_v7 = vadd.f32 %v1391_v51, %v1959_v29  ;;  %v1331_v16 = vpop.f32.mrb[28].mxu1 }
 0x2f2   : > { %1436 = vst [vmem:[%s2271_s26 + $0x40] sm:$0xff] %v1420_v58  ;;  %v1422_v25 = vmax.f32 %v1406_v5, 0.0  ;;  %v1364_v46 = vmul.f32 %v2250_v9, %v1331_v16  ;;  %v1333_v32 = vpop.f32.mrb[29].mxu1 }
 0x2f3   : > { %1437 = vst [vmem:[%s2271_s26 + $0x48] sm:$0xff] %v1421_v15  ;;  %v1423_v47 = vmax.f32 %v1407_v7, 0.0  ;;  %v1365_v48 = vmul.f32 %v2252_v56, %v1333_v32  ;;  %v1335_v28 = vpop.f32.mrb[30].mxu1 }
 0x2f4   : > { %1438 = vst [vmem:[%s2271_s26 + $0x50] sm:$0xff] %v1422_v25  ;;  %v1392_v49 = vadd.f32 %v2254_v17, %v1364_v46  ;;  %v1366_v33 = vmul.f32 %v2250_v9, %v1335_v28  ;;  %v1337_v52 = vpop.f32.mrb[31].mxu1 }
 0x2f5   : > { %1439 = vst [vmem:[%s2271_s26 + $0x58] sm:$0xff] %v1423_v47  ;;  %v1393_v29 = vadd.f32 %v2256_v45, %v1365_v48  ;;  %v1367_v53 = vmul.f32 %v2252_v56, %v1337_v52 }
 0x2f6   : > { %v1408_v54 = vadd.f32 %v1392_v49, %v1982_v38  ;;  %v1394_v55 = vadd.f32 %v2254_v17, %v1366_v33 }
 0x2f7   : > { %v1409_v19 = vadd.f32 %v1393_v29, %v1972_v34  ;;  %v1395_v57 = vadd.f32 %v2256_v45, %v1367_v53 }
 0x2f8   : > { %v1424_v59 = vmax.f32 %v1408_v54, 0.0  ;;  %v1410_v61 = vadd.f32 %v1394_v55, %v1985_v39 }
 0x2f9   : > { %v1425_v9 = vmax.f32 %v1409_v19, 0.0  ;;  %v1411_v63 = vadd.f32 %v1395_v57, %v1975_v35 }
 0x2fa   : > { %1440 = vst [vmem:[%s2271_s26 + $0x60] sm:$0xff] %v1424_v59  ;;  %v1426_v60 = vmax.f32 %v1410_v61, 0.0 }
 0x2fb   : > { %1441 = vst [vmem:[%s2271_s26 + $0x68] sm:$0xff] %v1425_v9  ;;  %v1427_v1 = vmax.f32 %v1411_v63, 0.0 }
 0x2fc   : > { %1442 = vst [vmem:[%s2271_s26 + $0x70] sm:$0xff] %v1426_v60 }
 0x2fd   : > { %1443 = vst [vmem:[%s2271_s26 + $0x78] sm:$0xff] %v1427_v1 }
 0x2fe PF: > { %s20_s13 = sadd.s32 1, %s1797_s13  }
 0x2ff   : > { %p17_p4 = scmp.ge.s32.totalorder %s20_s13, 4  }
 0x301   :  { %19 = sbr.rel (!%p17_p4) target bundleno = 1 (0x1), region = 90 }

</bundles_post_ra>
